<compile_context>
chip_gen: v7x
topology: tpu7x:2x2x1
jax: 0.10.0
libtpu: 0.0.40
codegen_flags: <defaults>
</compile_context>

<pallas_src>
import jax
import jax.numpy as jnp
from jax.experimental import pallas as pl
from jax.experimental.pallas import tpu as pltpu


def _round_up(v, m):
    return ((v + m - 1) // m) * m


def ca_net_kernel(x_ref, w_ref, b_ref, eps_ref, c_ref, mu_ref, lv_ref):
    """One batch tile: fused fc + GLU + reparametrization, entirely in VMEM."""
    f32 = jnp.float32
    cp = mu_ref.shape[-1]                       # lane-padded c_dim (multiple of 128)

    # Single lane-dense MXU matmul over all four column groups, f32 accumulation.
    y = jnp.dot(x_ref[...], w_ref[...], preferred_element_type=f32) + b_ref[...]

    # Whole-vreg slices: boundaries are multiples of 128 lanes, so no sub-vreg cuts.
    y_mu = y[:, 0 * cp:1 * cp]
    y_lv = y[:, 1 * cp:2 * cp]
    g_mu = y[:, 2 * cp:3 * cp]
    g_lv = y[:, 3 * cp:4 * cp]

    # GLU. sigmoid(x) == 0.5*tanh(0.5*x)+0.5 : one EUP push instead of exp+recip.
    mu = y_mu * (0.5 * jnp.tanh(0.5 * g_mu) + 0.5)
    logvar = y_lv * (0.5 * jnp.tanh(0.5 * g_lv) + 0.5)

    # Reparametrization: c = eps * exp(0.5*logvar) + mu.
    std = jnp.exp(0.5 * logvar)
    eps = eps_ref[...].astype(f32)              # [bt, c_dim]
    if eps.shape[-1] != cp:                     # lane-pad eps in VMEM (zero HBM cost)
        pad = jnp.zeros((eps.shape[0], cp - eps.shape[-1]), f32)
        eps = jnp.concatenate([eps, pad], axis=-1)

    # Three lane-dense (multiple-of-128) unmasked stores.
    c_ref[...] = eps * std + mu
    mu_ref[...] = mu
    lv_ref[...] = logvar


def ca_net_forward(text_embedding, fc_w, fc_b, eps, *,
                   use_bf16_matmul=False, batch_tile=512, trim_outputs=True):
    """text_embedding: [B, t_dim], fc_w: [t_dim, 4*c_dim], fc_b: [4*c_dim], eps: [B, c_dim].

    Returns (c_code, mu, logvar) float32; each [B, c_dim] (or [B, Cp] lane-padded
    if trim_outputs=False so consumers can fuse the trim themselves).
    """
    B, t_dim = text_embedding.shape
    four_c = fc_w.shape[1]
    assert four_c % 4 == 0, "fc output dim must be 4 * c_dim"
    c_dim = four_c // 4
    assert fc_b.shape == (four_c,)
    assert eps.shape == (B, c_dim)

    c_pad = _round_up(c_dim, 128)               # lane-dense feature width

    mm_dtype = jnp.bfloat16 if use_bf16_matmul else text_embedding.dtype
    x = text_embedding.astype(mm_dtype)
    eps_f32 = eps.astype(jnp.float32)

    # One-time weight prep (hoist / cache in real use): pack fc into a single
    # lane-padded slab [T, 4*Cp] with column groups
    # [mu_lin | logvar_lin | mu_gate | logvar_gate], each zero-padded to Cp lanes.
    w4 = fc_w.reshape(t_dim, 4, c_dim)
    w4 = jnp.pad(w4, ((0, 0), (0, 0), (0, c_pad - c_dim)))
    w4 = w4.reshape(t_dim, 4 * c_pad).astype(mm_dtype)
    b4 = jnp.pad(fc_b.reshape(4, c_dim), ((0, 0), (0, c_pad - c_dim)))
    b4 = b4.reshape(1, 4 * c_pad).astype(jnp.float32)

    # ---- batch tiling ---------------------------------------------------------
    # Sublane granularity follows the matmul dtype packing (8 f32 / 16 bf16 / 32 i8).
    sub = {4: 8, 2: 16, 1: 32}.get(jnp.dtype(mm_dtype).itemsize, 8)
    batch_tile = max(sub, _round_up(batch_tile, sub))
    if B <= sub:
        tile_b = B                              # single full-extent block (always legal)
    else:
        # Target >= 2 grid steps so v7x's two TensorCores both get work, capped at
        # batch_tile; the kernel is HBM-bound so bigger tiles are otherwise better.
        tile_b = min(_round_up(pl.cdiv(B, 2), sub), batch_tile)
        tile_b = min(tile_b, B)
    n_tiles = pl.cdiv(B, tile_b)                # ragged last tile -> masked writes

    const2d = lambda shape: pl.BlockSpec(shape, lambda i: (0, 0))   # grid-resident

    out_sds = jax.ShapeDtypeStruct((B, c_pad), jnp.float32)
    out_spec = pl.BlockSpec((tile_b, c_pad), lambda i: (i, 0))

    c_code, mu, logvar = pl.pallas_call(
        ca_net_kernel,
        out_shape=(out_sds, out_sds, out_sds),
        grid_spec=pltpu.PrefetchScalarGridSpec(
            num_scalar_prefetch=0,
            grid=(n_tiles,),
            in_specs=[
                pl.BlockSpec((tile_b, t_dim), lambda i: (i, 0)),    # x    (pipelined)
                const2d((t_dim, 4 * c_pad)),                        # W    (resident)
                const2d((1, 4 * c_pad)),                            # bias (resident)
                pl.BlockSpec((tile_b, c_dim), lambda i: (i, 0)),    # eps  (pipelined)
            ],
            out_specs=(out_spec, out_spec, out_spec),
        ),
        compiler_params=pltpu.CompilerParams(
            # Parallel batch axis -> Mosaic can shard steps across v7x's two TCs.
            dimension_semantics=("parallel",),
            # Working set at default tiles is a few MiB; set vmem_limit_bytes here
            # only if batch_tile is grown past ~1024 with large t_dim on v5e.
        ),
    )(x, w4, b4, eps_f32)

    if trim_outputs and c_pad != c_dim:
        # Consumers that accept the 128-lane-padded layout should pass
        # trim_outputs=False to skip this extra slice pass over the outputs.
        c_code, mu, logvar = (a[:, :c_dim] for a in (c_code, mu, logvar))
    return c_code, mu, logvar


if __name__ == "__main__":
    # Shapes consistent with the module: TEXT.EMBEDDING_DIM=32, GAN.CONDITION_DIM=16.
    B, t_dim, c_dim = 2, 32, 16

    key = jax.random.PRNGKey(0)
    k_x, k_w, k_b, k_eps = jax.random.split(key, 4)
    text_embedding = jax.random.normal(k_x, (B, t_dim), dtype=jnp.float32)
    fc_w = jax.random.normal(k_w, (t_dim, 4 * c_dim), dtype=jnp.float32) * 0.05
    fc_b = jax.random.normal(k_b, (4 * c_dim,), dtype=jnp.float32) * 0.05
    eps = jax.random.normal(k_eps, (B, c_dim), dtype=jnp.float32)

    def reference(x, w, b, e):
        y = x @ w + b
        c2 = w.shape[1] // 2
        c = c2 // 2
        glu = y[:, :c2] * jax.nn.sigmoid(y[:, c2:])
        mu = glu[:, :c]
        lv = glu[:, c:]
        return e * jnp.exp(0.5 * lv) + mu, mu, lv

    # ---- 1) f32 path, single-block grid: strict numerical check ----------------
    c_ref, mu_ref, lv_ref = reference(text_embedding, fc_w, fc_b, eps)
    c_code, mu, logvar = ca_net_forward(text_embedding, fc_w, fc_b, eps)
    jax.block_until_ready((c_code, mu, logvar))
    assert c_code.shape == (B, c_dim) and mu.shape == (B, c_dim)
    assert jnp.allclose(mu, mu_ref, atol=1e-5, rtol=1e-5)
    assert jnp.allclose(logvar, lv_ref, atol=1e-5, rtol=1e-5)
    assert jnp.allclose(c_code, c_ref, atol=1e-5, rtol=1e-5)

    # ---- 2) bf16-MXU path, multi-step parallel grid with a ragged last tile ----
    #      (B=20, tile=16 -> 2 grid steps; last step partially masked).
    B2 = 20
    k_x2, k_e2 = jax.random.split(jax.random.PRNGKey(1))
    x2 = jax.random.normal(k_x2, (B2, t_dim), dtype=jnp.float32)
    eps2 = jax.random.normal(k_e2, (B2, c_dim), dtype=jnp.float32)
    c2_ref, mu2_ref, lv2_ref = reference(x2, fc_w, fc_b, eps2)
    c2, mu2, lv2 = ca_net_forward(x2, fc_w, fc_b, eps2,
                                  use_bf16_matmul=True, batch_tile=16)
    jax.block_until_ready((c2, mu2, lv2))
    assert jnp.allclose(mu2, mu2_ref, atol=5e-2, rtol=5e-2)
    assert jnp.allclose(lv2, lv2_ref, atol=5e-2, rtol=5e-2)
    assert jnp.allclose(c2, c2_ref, atol=5e-2, rtol=5e-2)

    print("KERNEL_OK")
</pallas_src>

<mosaic_0001>
module attributes {stable_mosaic.version = 11 : i64} {
  func.func @ca_net_kernel(%arg0: i32, %arg1: memref<2x32xf32, #tpu.memory_space<vmem>>, %arg2: memref<32x512xf32, #tpu.memory_space<vmem>>, %arg3: memref<1x512xf32, #tpu.memory_space<vmem>>, %arg4: memref<2x16xf32, #tpu.memory_space<vmem>>, %arg5: memref<2x128xf32, #tpu.memory_space<vmem>>, %arg6: memref<2x128xf32, #tpu.memory_space<vmem>>, %arg7: memref<2x128xf32, #tpu.memory_space<vmem>>) attributes {dimension_semantics = [#tpu.dimension_semantics<parallel>], iteration_bounds = array<i64: 1>, scalar_prefetch = 0 : i64, scratch_operands = 0 : i64, tpu.core_type = #tpu.core_type<tc>, window_params = [{transform_indices = @transform_0, window_bounds = array<i64: 2, 32>}, {pipeline_mode = #tpu.pipeline_mode<synchronous>, transform_indices = @transform_1, window_bounds = array<i64: 32, 512>}, {pipeline_mode = #tpu.pipeline_mode<synchronous>, transform_indices = @transform_2, window_bounds = array<i64: 1, 512>}, {transform_indices = @transform_3, window_bounds = array<i64: 2, 16>}, {transform_indices = @transform_4, window_bounds = array<i64: 2, 128>}, {transform_indices = @transform_5, window_bounds = array<i64: 2, 128>}, {transform_indices = @transform_6, window_bounds = array<i64: 2, 128>}]} {
    %c0 = arith.constant 0 : index
    %c0_0 = arith.constant 0 : index
    %0 = vector.load %arg1[%c0, %c0_0] : memref<2x32xf32, #tpu.memory_space<vmem>>, vector<2x32xf32>
    %c0_1 = arith.constant 0 : index
    %c0_2 = arith.constant 0 : index
    %1 = vector.load %arg2[%c0_1, %c0_2] : memref<32x512xf32, #tpu.memory_space<vmem>>, vector<32x512xf32>
    %cst = arith.constant dense<0.000000e+00> : vector<2x512xf32>
    %2 = tpu.matmul %0, %1, %cst {dimension_numbers = #tpu.dot_dimension_numbers<[1], [0], [0], [1], [0, 0, 1, 1], [], []>} : vector<2x32xf32>, vector<32x512xf32>, vector<2x512xf32> -> vector<2x512xf32>
    %c0_3 = arith.constant 0 : index
    %c0_4 = arith.constant 0 : index
    %3 = vector.load %arg3[%c0_3, %c0_4] : memref<1x512xf32, #tpu.memory_space<vmem>>, vector<1x512xf32>
    %4 = vector.broadcast %3 : vector<1x512xf32> to vector<2x512xf32>
    %5 = arith.addf %2, %4 : vector<2x512xf32>
    %6 = vector.extract_strided_slice %5 {offsets = [0, 0], sizes = [2, 128], strides = [1, 1]} : vector<2x512xf32> to vector<2x128xf32>
    %7 = vector.extract_strided_slice %5 {offsets = [0, 128], sizes = [2, 128], strides = [1, 1]} : vector<2x512xf32> to vector<2x128xf32>
    %8 = vector.extract_strided_slice %5 {offsets = [0, 256], sizes = [2, 128], strides = [1, 1]} : vector<2x512xf32> to vector<2x128xf32>
    %9 = vector.extract_strided_slice %5 {offsets = [0, 384], sizes = [2, 128], strides = [1, 1]} : vector<2x512xf32> to vector<2x128xf32>
    %cst_5 = arith.constant 5.000000e-01 : f32
    %10 = vector.broadcast %cst_5 : f32 to vector<2x128xf32>
    %11 = arith.mulf %10, %8 : vector<2x128xf32>
    %12 = math.tanh %11 : vector<2x128xf32>
    %cst_6 = arith.constant 5.000000e-01 : f32
    %13 = vector.broadcast %cst_6 : f32 to vector<2x128xf32>
    %14 = arith.mulf %13, %12 : vector<2x128xf32>
    %cst_7 = arith.constant 5.000000e-01 : f32
    %15 = vector.broadcast %cst_7 : f32 to vector<2x128xf32>
    %16 = arith.addf %14, %15 : vector<2x128xf32>
    %17 = arith.mulf %6, %16 : vector<2x128xf32>
    %cst_8 = arith.constant 5.000000e-01 : f32
    %18 = vector.broadcast %cst_8 : f32 to vector<2x128xf32>
    %19 = arith.mulf %18, %9 : vector<2x128xf32>
    %20 = math.tanh %19 : vector<2x128xf32>
    %cst_9 = arith.constant 5.000000e-01 : f32
    %21 = vector.broadcast %cst_9 : f32 to vector<2x128xf32>
    %22 = arith.mulf %21, %20 : vector<2x128xf32>
    %cst_10 = arith.constant 5.000000e-01 : f32
    %23 = vector.broadcast %cst_10 : f32 to vector<2x128xf32>
    %24 = arith.addf %22, %23 : vector<2x128xf32>
    %25 = arith.mulf %7, %24 : vector<2x128xf32>
    %cst_11 = arith.constant 5.000000e-01 : f32
    %26 = vector.broadcast %cst_11 : f32 to vector<2x128xf32>
    %27 = arith.mulf %26, %25 : vector<2x128xf32>
    %28 = math.exp %27 : vector<2x128xf32>
    %c0_12 = arith.constant 0 : index
    %c0_13 = arith.constant 0 : index
    %29 = vector.load %arg4[%c0_12, %c0_13] : memref<2x16xf32, #tpu.memory_space<vmem>>, vector<2x16xf32>
    %cst_14 = arith.constant 0.000000e+00 : f32
    %30 = vector.broadcast %cst_14 : f32 to vector<2x112xf32>
    %31 = tpu.concatenate %29, %30 in 1 : vector<2x16xf32>, vector<2x112xf32> -> vector<2x128xf32>
    %32 = arith.mulf %31, %28 : vector<2x128xf32>
    %33 = arith.addf %32, %17 : vector<2x128xf32>
    %c0_15 = arith.constant 0 : index
    %c0_16 = arith.constant 0 : index
    %34 = vector.load %arg5[%c0_15, %c0_16] : memref<2x128xf32, #tpu.memory_space<vmem>>, vector<2x128xf32>
    tpu.vector_store %arg5[%c0_15, %c0_16], %33 {strides = array<i32>} : memref<2x128xf32, #tpu.memory_space<vmem>>, vector<2x128xf32>,
    %c0_17 = arith.constant 0 : index
    %c0_18 = arith.constant 0 : index
    %35 = vector.load %arg6[%c0_17, %c0_18] : memref<2x128xf32, #tpu.memory_space<vmem>>, vector<2x128xf32>
    tpu.vector_store %arg6[%c0_17, %c0_18], %17 {strides = array<i32>} : memref<2x128xf32, #tpu.memory_space<vmem>>, vector<2x128xf32>,
    %c0_19 = arith.constant 0 : index
    %c0_20 = arith.constant 0 : index
    %36 = vector.load %arg7[%c0_19, %c0_20] : memref<2x128xf32, #tpu.memory_space<vmem>>, vector<2x128xf32>
    tpu.vector_store %arg7[%c0_19, %c0_20], %25 {strides = array<i32>} : memref<2x128xf32, #tpu.memory_space<vmem>>, vector<2x128xf32>,
    return
  }
  func.func @transform_0(%arg0: i32) -> (i32, i32) {
    %c0_i32 = arith.constant 0 : i32
    %c0_i32_0 = arith.constant 0 : i32
    return %arg0, %c0_i32 : i32, i32
  }
  func.func @transform_1(%arg0: i32) -> (i32, i32) {
    %c0_i32 = arith.constant 0 : i32
    %c0_i32_0 = arith.constant 0 : i32
    %c0_i32_1 = arith.constant 0 : i32
    return %c0_i32, %c0_i32_0 : i32, i32
  }
  func.func @transform_2(%arg0: i32) -> (i32, i32) {
    %c0_i32 = arith.constant 0 : i32
    %c0_i32_0 = arith.constant 0 : i32
    %c0_i32_1 = arith.constant 0 : i32
    return %c0_i32, %c0_i32_0 : i32, i32
  }
  func.func @transform_3(%arg0: i32) -> (i32, i32) {
    %c0_i32 = arith.constant 0 : i32
    %c0_i32_0 = arith.constant 0 : i32
    return %arg0, %c0_i32 : i32, i32
  }
  func.func @transform_4(%arg0: i32) -> (i32, i32) {
    %c0_i32 = arith.constant 0 : i32
    %c0_i32_0 = arith.constant 0 : i32
    return %arg0, %c0_i32 : i32, i32
  }
  func.func @transform_5(%arg0: i32) -> (i32, i32) {
    %c0_i32 = arith.constant 0 : i32
    %c0_i32_0 = arith.constant 0 : i32
    return %arg0, %c0_i32 : i32, i32
  }
  func.func @transform_6(%arg0: i32) -> (i32, i32) {
    %c0_i32 = arith.constant 0 : i32
    %c0_i32_0 = arith.constant 0 : i32
    return %arg0, %c0_i32 : i32, i32
  }
}

</mosaic_0001>

<bundles_post_ra>
// kernel: tpu_custom_call.1
= control target key start
LH: loop header
LB: loop body
LE: loop exit
PB: predicated region body
PF: predicated region fallthrough
CT: control target
= control target key end

     0   :  { %12 = vsyncpa [#allocation3], 0  ;;  %s570_s0 = inlined_call_operand.hbm [shape: f32[2,32], index: 0, kind: input, shape index: {}]   ;;  %s571_s1 = inlined_call_operand.hbm [shape: f32[32,512], index: 1, kind: input, shape index: {}]   ;;  %s572_s2 = inlined_call_operand.vmem [shape: f32[1,512], index: 2, kind: input, shape index: {}]   ;;  %s573_s3 = inlined_call_operand.vmem [shape: f32[2,16], index: 3, kind: input, shape index: {}]   ;;  %s574_s4 = inlined_call_operand.hbm [shape: f32[2,128], index: 4, kind: output, shape index: {0}]   ;;  %s575_s5 = inlined_call_operand.hbm [shape: f32[2,128], index: 5, kind: output, shape index: {1}]   ;;  %s576_s6 = inlined_call_operand.hbm [shape: f32[2,128], index: 6, kind: output, shape index: {2}]  }
   0x1   :  { %13 = vsyncpa [#allocation6], 0 }
   0x2   :  { %14 = vsyncpa [#allocation4], 0 }
   0x3   :  { %15 = vsyncpa [#allocation9], 0  ;;  %s447_s21 = smov [#allocation2]   ;;  %s448_s23 = smov [#allocation5]  }
   0x4   :  { %s22_s22 = sshll.u32 %s447_s21, 4  ;;  %s31_s24 = sshll.u32 %s448_s23, 4  ;;  %s23_s22 = int_to_ptr.vmem [resolvable:$true] %s22_s22  ;;  %s490_s24 = int_to_ptr.vmem [resolvable:$true] %s31_s24 }
   0x5   :  { %s329_s27 = scalar_lea.hbm %s570_s0, 32 }
   0x6   :  { %p330_p0 = scmp.ne.s32.totalorder %s570_s0, %s329_s27  ;;  %p333_p1 = scmp.lt.u32.totalorder %s329_s27, %s570_s0 }
   0x8   :  { %p335_p2 = pnand %p333_p1, %p330_p0 }
   0xa   :  { %338 = shalt.err (!%p335_p2)
}
   0xb   :  { %s339_s8 = scalar_lea.vmem %s23_s22, 32  ;;  %p344_p4 = scmp.lt.s32.totalorder %s23_s22, %s23_s22 }
   0xc   :  { %p340_p3 = scmp.ne.s32.totalorder %s23_s22, %s339_s8  ;;  %p345_p5 = scmp.lt.s32.totalorder %s339_s8, %s339_s8 }
   0xe   :  { %p346_p6 = por %p345_p5, %p344_p4 }
  0x10   :  { %p347_p7 = pnand %p346_p6, %p340_p3 }
  0x12   :  { %350 = shalt.err (!%p347_p7)
}
  0x13   :  { %25 = dma.hbm_to_vmem [thread:$0]  %s570_s0, 32, %s23_s22, [#allocation3]  }
  0x14   :  { %s351_s13 = scalar_lea.hbm %s571_s1, 2048 }
  0x15   :  { %p352_p8 = scmp.ne.s32.totalorder %s571_s1, %s351_s13  ;;  %p355_p9 = scmp.lt.u32.totalorder %s351_s13, %s571_s1 }
  0x17   :  { %p357_p10 = pnand %p355_p9, %p352_p8 }
  0x19   :  { %360 = shalt.err (!%p357_p10)
}
  0x1a   :  { %s361_s18 = scalar_lea.vmem %s490_s24, 2048  ;;  %p366_p12 = scmp.lt.s32.totalorder %s490_s24, %s490_s24 }
  0x1b   :  { %p362_p11 = scmp.ne.s32.totalorder %s490_s24, %s361_s18  ;;  %p367_p13 = scmp.lt.s32.totalorder %s361_s18, %s361_s18 }
  0x1d   :  { %p368_p0 = por %p367_p13, %p366_p12 }
  0x1f   :  { %p369_p1 = pnand %p368_p0, %p362_p11 }
  0x21   :  { %372 = shalt.err (!%p369_p1)
}
  0x22   :  { %s449_s0 = smov 512   ;;  %s450_s19 = smov 32  }
  0x23   :  { %37 = dma.hbm_to_vmem [thread:$0]  %s571_s1, 2048, %s490_s24, [#allocation6], %s449_s0, %s449_s0, %s450_s19  }
  0x24   :  { %439 = dma.done.wait [#allocation3], 32  }
  0x25   :  { %440 = vsyncadd [#allocation3], 4294967264 }
  0x26   :  { %441 = dma.done.wait [#allocation6], 2048  }
  0x27   :  { %442 = vsyncadd [#allocation6], 4294965248  ;;  %v451_v0 = vmov 0.0   ;;  %v52_v1 = vld [vmem:[#allocation5 + $0x18] sm:$0xff]  ;;  %v51_v3 = vld [vmem:[#allocation5 + $0x10] sm:$0xff]  ;;  %vm87_vm0 = vcmask 261120   ;;  %v67_v26 = vlaneseq }
  0x28   :  { %226 = vmatprep.mubr.f32.mxu1 %v451_v0  ;;  %155 = vmatprep.mubr.f32.mxu0 %v451_v0  ;;  %v56_v2 = vld [vmem:[#allocation5 + $0x38] sm:$0xff]  ;;  %v55_v5 = vld [vmem:[#allocation5 + $0x30] sm:$0xff]  ;;  %v50_v12 = vld [vmem:[#allocation5 + $0x8] sm:$0xff]  ;;  %s453_s24 = smov [#allocation10]  }
  0x29   :  { %v307_v4 = vpack.c.bf16 %v56_v2, %v52_v1  ;;  %v60_v6 = vld [vmem:[#allocation5 + $0x58] sm:$0xff]  ;;  %v309_v8 = vpack.c.bf16 %v55_v5, %v51_v3  ;;  %v59_v10 = vld [vmem:[#allocation5 + $0x50] sm:$0xff]  ;;  %v54_v13 = vld [vmem:[#allocation5 + $0x28] sm:$0xff]  ;;  %v68_v27 = vshrl.u32 %v67_v26, 7  ;;  %s280_s25 = sshll.u32 %s453_s24, 4  ;;  %s524_s25 = int_to_ptr.vmem [resolvable:$true] %s280_s25 }
  0x2a   :  { %v64_v7 = vld [vmem:[#allocation5 + $0x78] sm:$0xff]  ;;  %v63_v11 = vld [vmem:[#allocation5 + $0x70] sm:$0xff]  ;;  %v49_v14 = vld [vmem:[#allocation5] sm:$0xff]  ;;  %v299_v16 = vpack.c.bf16 %v54_v13, %v50_v12 }
  0x2b   :  { %v311_v9 = vpack.c.bf16 %v64_v7, %v60_v6  ;;  %308 = vmatprep.subr.bf16.mxu1 %v307_v4  ;;  %v313_v15 = vpack.c.bf16 %v63_v11, %v59_v10  ;;  %v53_v17 = vld [vmem:[#allocation5 + $0x20] sm:$0xff]  ;;  %v58_v18 = vld [vmem:[#allocation5 + $0x48] sm:$0xff]  ;;  %v48_v25 = vld [vmem:[#allocation2] sm:$0x3]  ;;  %v77_v28 = vsub.s32 2, %v68_v27  ;;  %v81_v30 = vsub.s32 3, %v68_v27 }
  0x2c   :  { %310 = vmatpush1.bf16.msra.mxu1 %v309_v8  ;;  %v62_v19 = vld [vmem:[#allocation5 + $0x68] sm:$0xff]  ;;  %v301_v20 = vpack.c.bf16 %v53_v17, %v49_v14  ;;  %v57_v22 = vld [vmem:[#allocation5 + $0x40] sm:$0xff]  ;;  %300 = vmatprep.subr.bf16.mxu0 %v299_v16  ;;  %v65_v29 = vld [vmem:[%s572_s2] sm:$0xf]  ;;  %v69_v41 = vsub.s32 0, %v68_v27  ;;  %v73_v42 = vsub.s32 1, %v68_v27 }
  0x2d   :  { %312 = vmatprep.subr.bf16.mxu1 %v311_v9  ;;  %v303_v21 = vpack.c.bf16 %v62_v19, %v58_v18  ;;  %v61_v23 = vld [vmem:[#allocation5 + $0x60] sm:$0xff]  ;;  %v78_v31 = vrot.slane %v65_v29, %v77_v28  ;;  %v82_v32 = vrot.slane %v65_v29, %v81_v30  ;;  %s452_s2 = smov [#allocation8]  }
  0x2e   :  { %302 = vmatpush1.bf16.msra.mxu0 %v301_v20  ;;  %v305_v24 = vpack.c.bf16 %v61_v23, %v57_v22  ;;  %v70_v43 = vrot.slane %v65_v29, %v69_v41  ;;  %v74_v44 = vrot.slane %v65_v29, %v73_v42  ;;  %s270_s23 = sshll.u32 %s452_s2, 4  ;;  %s271_s23 = int_to_ptr.vmem [resolvable:$true] %s270_s23 }
  0x2f   :  { %304 = vmatprep.subr.bf16.mxu0 %v303_v21  ;;  %s373_s26 = scalar_lea.vmem %s271_s23, 32  ;;  %p378_p3 = scmp.lt.s32.totalorder %s271_s23, %s271_s23 }
  0x30   :  { %314 = vmatpush1.bf16.msra.mxu1 %v313_v15  ;;  %p374_p2 = scmp.ne.s32.totalorder %s271_s23, %s373_s26  ;;  %p379_p4 = scmp.lt.s32.totalorder %s373_s26, %s373_s26 }
  0x32   :  { %306 = vmatpush1.bf16.msra.mxu0 %v305_v24  ;;  %p380_p5 = por %p379_p4, %p378_p3 }
  0x33   :  { %298 = vmatmul.mubr.msk.f32.vlgmr.msra.gmra.mrb[0].mxu1 %vm87_vm0, %v48_v25 }
  0x34   :  { %p381_p6 = pnand %p380_p5, %p374_p2 }
  0x35   :  { %297 = vmatmul.mubr.msk.f32.vlgmr.msra.gmra.mrb[0].mxu0 %vm87_vm0, %v48_v25 }
 0x106   :  { %v228_v33 = vpop.f32.mrb[0].mxu1 }
 0x107   :  { %v229_v34 = vadd.f32 %v228_v33, %v78_v31  ;;  %v230_v35 = vpop.f32.mrb[1].mxu1 }
 0x108   :  { %v231_v36 = vadd.f32 %v230_v35, %v82_v32  ;;  %v157_v38 = vpop.f32.mrb[0].mxu0 }
 0x109   :  { %v233_v37 = vmul.f32 0.5, %v229_v34  ;;  %v159_v40 = vpop.f32.mrb[1].mxu0  ;;  %v158_v48 = vadd.f32 %v157_v38, %v70_v43 }
 0x10a   :  { %v238_v39 = vmul.f32 0.5, %v231_v36  ;;  %v160_v50 = vadd.f32 %v159_v40, %v74_v44 }
 0x10b   :  { %323 = vtanh.f32 %v233_v37 }
 0x10c   :  { %325 = vtanh.f32 %v238_v39 }
 0x115   :  { %v324_v45 = vpop.eup %323 }
 0x116   :  { %v326_v46 = vpop.eup %325  ;;  %v235_v47 = vmul.f32 0.5, %v324_v45 }
 0x117   :  { %v240_v49 = vmul.f32 0.5, %v326_v46 }
 0x118   :  { %v236_v51 = vadd.f32 0.5, %v235_v47 }
 0x119   :  { %v241_v52 = vadd.f32 0.5, %v240_v49 }
 0x11a   :  { %v237_v53 = vmul.f32 %v236_v51, %v158_v48 }
 0x11b   :  { %v242_v54 = vmul.f32 %v241_v52, %v160_v50 }
 0x11c   :  { %252 = vst [vmem:[#allocation8] sm:$0x3] %v237_v53 }
 0x11d   :  { %v243_v55 = vmul.f32 0.5, %v242_v54  ;;  %253 = vst [vmem:[#allocation10] sm:$0x3] %v242_v54 }
 0x11e   :  { %384 = shalt.err (!%p381_p6)
}
 0x11f   :  { %s385_s29 = scalar_lea.hbm %s575_s5, 32 }
 0x120   :  { %p386_p7 = scmp.ne.s32.totalorder %s575_s5, %s385_s29  ;;  %p389_p8 = scmp.lt.u32.totalorder %s385_s29, %s575_s5 }
 0x122   :  { %p391_p9 = pnand %p389_p8, %p386_p7 }
 0x124   :  { %394 = shalt.err (!%p391_p9)
}
 0x125   :  { %273 = dma.vmem_to_hbm [thread:$0]  %s271_s23, 32, %s575_s5, [#allocation9]  }
 0x126   :  { %s395_s12 = scalar_lea.vmem %s524_s25, 32  ;;  %p400_p11 = scmp.lt.s32.totalorder %s524_s25, %s524_s25 }
 0x127   :  { %p396_p10 = scmp.ne.s32.totalorder %s524_s25, %s395_s12  ;;  %p401_p12 = scmp.lt.s32.totalorder %s395_s12, %s395_s12 }
 0x129   :  { %p402_p13 = por %p401_p12, %p400_p11 }
 0x12b   :  { %p403_p0 = pnand %p402_p13, %p396_p10 }
 0x12d   :  { %406 = shalt.err (!%p403_p0)
}
 0x12e   :  { %s407_s15 = scalar_lea.hbm %s576_s6, 32 }
 0x12f   :  { %p408_p1 = scmp.ne.s32.totalorder %s576_s6, %s407_s15  ;;  %p411_p2 = scmp.lt.u32.totalorder %s407_s15, %s576_s6 }
 0x131   :  { %p413_p3 = pnand %p411_p2, %p408_p1 }
 0x133   :  { %416 = shalt.err (!%p413_p3)
}
 0x134   :  { %283 = dma.vmem_to_hbm [thread:$0]  %s524_s25, 32, %s576_s6, [#allocation9]   ;;  %v244_v56 = vmul.f32 1.442695, %v243_v55  ;;  %v246_v57 = vld [vmem:[%s573_s3] sm:$0x3] }
 0x135   :  { %vm247_vm1 = vcmask 130048   ;;  %s454_s1 = smov [#allocation7]  }
 0x136   :  { %327 = vpow2.f32 %v244_v56  ;;  %v248_v58 = vsel %vm247_vm1, %v246_v57, 0.0  ;;  %s260_s22 = sshll.u32 %s454_s1, 4  ;;  %s261_s22 = int_to_ptr.vmem [resolvable:$true] %s260_s22 }
 0x137   :  { %s417_s2 = scalar_lea.vmem %s261_s22, 32  ;;  %p422_p5 = scmp.lt.s32.totalorder %s261_s22, %s261_s22 }
 0x138   :  { %p418_p4 = scmp.ne.s32.totalorder %s261_s22, %s417_s2  ;;  %p423_p6 = scmp.lt.s32.totalorder %s417_s2, %s417_s2 }
 0x13a   :  { %p424_p7 = por %p423_p6, %p422_p5 }
 0x13c   :  { %p425_p8 = pnand %p424_p7, %p418_p4 }
 0x140   :  { %v328_v59 = vpop.eup %327 }
 0x141   :  { %v249_v60 = vmul.f32 %v328_v59, %v248_v58 }
 0x143   :  { %v250_v61 = vadd.f32 %v249_v60, %v237_v53 }
 0x145   :  { %251 = vst [vmem:[#allocation7] sm:$0x3] %v250_v61 }
 0x146   :  { %428 = shalt.err (!%p425_p8)
}
 0x147   :  { %s429_s3 = scalar_lea.hbm %s574_s4, 32 }
 0x148   :  { %p430_p9 = scmp.ne.s32.totalorder %s574_s4, %s429_s3  ;;  %p433_p10 = scmp.lt.u32.totalorder %s429_s3, %s574_s4 }
 0x14a   :  { %p435_p11 = pnand %p433_p10, %p430_p9 }
 0x14c   :  { %438 = shalt.err (!%p435_p11)
}
 0x14d   :  { %263 = dma.vmem_to_hbm [thread:$0]  %s261_s22, 32, %s574_s4, [#allocation4]  }
 0x14e   :  { %443 = dma.done.wait [#allocation4], 32  }
 0x14f   :  { %444 = vsyncadd [#allocation4], 4294967264 }
 0x150   :  { %445 = dma.done.wait [#allocation9], 64  }
 0x151   :  { %446 = vsyncadd [#allocation9], 4294967232 }
 0x152   :  { %293 = vsyncpa [#allocation3], 1 }
 0x153   :  { %294 = vsyncpa [#allocation6], 1 }
 0x154   :  { %295 = vsyncpa [#allocation4], 1 }
 0x155   :  { %296 = vsyncpa [#allocation9], 1 }

</bundles_post_ra>
